<compile_context>
chip_gen: v5e
topology: v5e:2x2
jax: 0.10.0
libtpu: 0.0.40
codegen_flags: <defaults>
</compile_context>

<pallas_src>
from functools import partial

import jax
import jax.numpy as jnp
from jax.experimental import pallas as pl
from jax.experimental.pallas import tpu as pltpu


def diffusion_kernel(w_ref, mask_ref, u_ref, out_ref, wsym_ref, rowsum_ref, *,
                     matmul_in_bf16=False):
    # ---- one-time W preprocessing, reused across all column blocks ----
    @pl.when(pl.program_id(0) == 0)
    def _():
        N = w_ref.shape[0]
        W = w_ref[...].astype(jnp.float32)
        M = mask_ref[...].astype(jnp.float32)
        # lower-triangular (incl. diagonal) select fused with the external mask.
        # TPU requires >= 2-D iota.
        row = jax.lax.broadcasted_iota(jnp.int32, (N, N), 0)
        col = jax.lax.broadcasted_iota(jnp.int32, (N, N), 1)
        Wtril = jnp.where(row >= col, W * M, jnp.zeros_like(W))
        # Symmetrize (XLU transpose, essentially free at this size).
        Wsym = Wtril + Wtril.T
        wsym_ref[...] = Wsym
        rowsum_ref[...] = jnp.sum(Wsym, axis=1, keepdims=True)

    # ---- per-block work: dot + axpy only ----
    Wsym = wsym_ref[...]
    U = u_ref[...]
    if matmul_in_bf16:
        acc = jnp.dot(Wsym.astype(jnp.bfloat16), U.astype(jnp.bfloat16),
                      preferred_element_type=jnp.float32)
    else:
        acc = jnp.dot(Wsym, U.astype(jnp.float32),
                      preferred_element_type=jnp.float32)
    # (Wsym - diag(rowsum)) @ U == Wsym @ U - rowsum * U   (no diag materialized)
    acc = acc - rowsum_ref[...] * U.astype(jnp.float32)
    out_ref[...] = acc.astype(out_ref.dtype)


def diffusion_reference(W, mask, U):
    Wtril = jnp.tril(W) * mask
    Wsym = Wtril + Wtril.T
    D = jnp.diag(Wsym.sum(1))
    return (Wsym - D) @ U


def diffusion_forward(W, mask, U, *, max_lane_block=512, min_pallas_cols=512,
                      force_pallas=False, matmul_in_bf16=False):
    """Compute (tril(W)*mask symmetrized Laplacian) @ U.

    U may have any number of columns. Batched problems can be concatenated along
    the column axis (U: [N, B*F]) to amortize launch overhead. For tiny unbatched
    calls the fused pure-JAX path is used unless force_pallas=True.
    """
    N = W.shape[0]
    F = U.shape[1]

    # Dispatch guard: at N=16 and few columns the Pallas launch overhead exceeds
    # the entire workload; let XLA fuse it instead.
    if not force_pallas and F < min_pallas_cols:
        return diffusion_reference(W, mask, U)

    # Lane-dense column blocking: collapse to a single grid step whenever the
    # padded feature dim fits one block.
    max_lane_block = max(128, (max_lane_block // 128) * 128)
    f128 = ((F + 127) // 128) * 128
    if f128 <= max_lane_block:
        block = f128
        f_pad = f128
    else:
        block = max_lane_block
        f_pad = ((F + block - 1) // block) * block
    n_blocks = f_pad // block

    U_p = U if f_pad == F else jnp.pad(U, ((0, 0), (0, f_pad - F)))

    # Explicit VMEM budget: W/mask (double-buffered) + U/out blocks (double-
    # buffered) + Wsym/rowsum scratch, with generous headroom.
    itemsize = 4
    vmem_est = itemsize * (2 * 2 * N * N + 2 * 2 * N * block + N * N + N * 128)
    vmem_limit = int(min(max(2 * vmem_est + (1 << 20), 32 * 1024 * 1024),
                         96 * 1024 * 1024))

    out = pl.pallas_call(
        partial(diffusion_kernel, matmul_in_bf16=matmul_in_bf16),
        out_shape=jax.ShapeDtypeStruct((N, f_pad), U.dtype),
        grid=(n_blocks,),
        in_specs=[
            pl.BlockSpec((N, N), lambda j: (0, 0)),
            pl.BlockSpec((N, N), lambda j: (0, 0)),
            pl.BlockSpec((N, block), lambda j: (0, j)),
        ],
        out_specs=pl.BlockSpec((N, block), lambda j: (0, j)),
        scratch_shapes=[
            pltpu.VMEM((N, N), jnp.float32),   # Wsym  (hoisted, reused)
            pltpu.VMEM((N, 1), jnp.float32),   # rowsum (hoisted, reused)
        ],
        compiler_params=pltpu.CompilerParams(
            # "arbitrary": the scratch hoist must not be megacore-sharded on v7x.
            dimension_semantics=("arbitrary",),
            vmem_limit_bytes=vmem_limit,
        ),
    )(W, mask, U_p)

    return out if f_pad == F else out[:, :F]


if __name__ == "__main__":
    N = 16   # num_node
    F = 32   # per-problem feature dim of U

    key = jax.random.PRNGKey(0)
    k_w, k_m, k_u, k_ub = jax.random.split(key, 4)

    # Deterministic "parameters": W ~ U[0,1) like np.random.rand in __init__.
    # Torch uses float64 for this parameter; we use float32 on TPU (documented deviation).
    W = jax.random.uniform(k_w, (N, N), dtype=jnp.float32)
    # self.mask is set externally in the original code; use a deterministic 0/1 mask.
    mask = (jax.random.uniform(k_m, (N, N)) > 0.5).astype(jnp.float32)

    # Case 1: tiny single problem -> dispatch guard routes to the fused XLA path.
    U = jax.random.normal(k_u, (N, F), dtype=jnp.float32)
    ref = diffusion_reference(W, mask, U)
    out = jax.block_until_ready(diffusion_forward(W, mask, U))
    assert out.shape == (N, F)
    assert jnp.allclose(out, ref, atol=1e-4, rtol=1e-4), "mismatch (F=32, fallback)"

    # Case 2: force the Pallas path on the tiny problem (single 128-lane block, grid=(1,)).
    out_p = jax.block_until_ready(diffusion_forward(W, mask, U, force_pallas=True))
    assert out_p.shape == (N, F)
    assert jnp.allclose(out_p, ref, atol=1e-4, rtol=1e-4), "mismatch (F=32, pallas)"

    # Case 3: batched / lane-dense usage: 1000 columns -> padded to 1024, two
    # 512-wide blocks; exercises the Wsym/rowsum scratch reuse across grid steps
    # and the pad/slice path.
    Fb = 1000
    Ub = jax.random.normal(k_ub, (N, Fb), dtype=jnp.float32)
    refb = diffusion_reference(W, mask, Ub)
    outb = jax.block_until_ready(diffusion_forward(W, mask, Ub))
    assert outb.shape == (N, Fb)
    assert jnp.allclose(outb, refb, atol=1e-4, rtol=1e-4), "mismatch (batched)"

    print("KERNEL_OK")
</pallas_src>

<mosaic_0001>
module attributes {stable_mosaic.version = 11 : i64} {
  func.func @diffusion_kernel(%arg0: i32, %arg1: memref<16x16xf32, #tpu.memory_space<vmem>>, %arg2: memref<16x16xf32, #tpu.memory_space<vmem>>, %arg3: memref<16x128xf32, #tpu.memory_space<vmem>>, %arg4: memref<16x128xf32, #tpu.memory_space<vmem>>, %arg5: memref<16x16xf32, #tpu.memory_space<vmem>>, %arg6: memref<16x1xf32, #tpu.memory_space<vmem>>) attributes {dimension_semantics = [#tpu.dimension_semantics<arbitrary>], iteration_bounds = array<i64: 1>, scalar_prefetch = 0 : i64, scratch_operands = 2 : i64, tpu.core_type = #tpu.core_type<tc>, window_params = [{pipeline_mode = #tpu.pipeline_mode<synchronous>, transform_indices = @transform_0, window_bounds = array<i64: 16, 16>}, {pipeline_mode = #tpu.pipeline_mode<synchronous>, transform_indices = @transform_1, window_bounds = array<i64: 16, 16>}, {transform_indices = @transform_2, window_bounds = array<i64: 16, 128>}, {transform_indices = @transform_3, window_bounds = array<i64: 16, 128>}]} {
    %c0_i32 = arith.constant 0 : i32
    %0 = arith.cmpi eq, %arg0, %c0_i32 : i32
    %1 = arith.extui %0 : i1 to i32
    %c0_i32_0 = arith.constant 0 : i32
    %2 = arith.cmpi ne, %1, %c0_i32_0 : i32
    scf.if %2 {
      %c0_8 = arith.constant 0 : index
      %c0_9 = arith.constant 0 : index
      %11 = vector.load %arg1[%c0_8, %c0_9] : memref<16x16xf32, #tpu.memory_space<vmem>>, vector<16x16xf32>
      %c0_10 = arith.constant 0 : index
      %c0_11 = arith.constant 0 : index
      %12 = vector.load %arg2[%c0_10, %c0_11] : memref<16x16xf32, #tpu.memory_space<vmem>>, vector<16x16xf32>
      %13 = tpu.iota {dimensions = array<i32: 0>} : vector<16x16xi32>
      %14 = tpu.iota {dimensions = array<i32: 1>} : vector<16x16xi32>
      %15 = arith.cmpi sge, %13, %14 : vector<16x16xi32>
      %16 = arith.mulf %11, %12 : vector<16x16xf32>
      %cst_12 = arith.constant 0.000000e+00 : f32
      %17 = vector.broadcast %cst_12 : f32 to vector<16x16xf32>
      %18 = arith.select %15, %16, %17 : vector<16x16xi1>, vector<16x16xf32>
      %19 = tpu.transpose %18, [1, 0] : vector<16x16xf32> -> vector<16x16xf32>
      %20 = arith.addf %18, %19 : vector<16x16xf32>
      %c0_13 = arith.constant 0 : index
      %c0_14 = arith.constant 0 : index
      %21 = vector.load %arg5[%c0_13, %c0_14] : memref<16x16xf32, #tpu.memory_space<vmem>>, vector<16x16xf32>
      tpu.vector_store %arg5[%c0_13, %c0_14], %20 {strides = array<i32>} : memref<16x16xf32, #tpu.memory_space<vmem>>, vector<16x16xf32>,
      %cst_15 = arith.constant dense<0.000000e+00> : vector<16xf32>
      %22 = vector.multi_reduction <add>, %20, %cst_15 [1] : vector<16x16xf32> to vector<16xf32>
      %23 = vector.shape_cast %22 : vector<16xf32> to vector<16x1xf32>
      %c0_16 = arith.constant 0 : index
      %c0_17 = arith.constant 0 : index
      %24 = vector.load %arg6[%c0_16, %c0_17] : memref<16x1xf32, #tpu.memory_space<vmem>>, vector<16x1xf32>
      tpu.vector_store %arg6[%c0_16, %c0_17], %23 {strides = array<i32>} : memref<16x1xf32, #tpu.memory_space<vmem>>, vector<16x1xf32>,
    } else {
    }
    %c0 = arith.constant 0 : index
    %c0_1 = arith.constant 0 : index
    %3 = vector.load %arg5[%c0, %c0_1] : memref<16x16xf32, #tpu.memory_space<vmem>>, vector<16x16xf32>
    %c0_2 = arith.constant 0 : index
    %c0_3 = arith.constant 0 : index
    %4 = vector.load %arg3[%c0_2, %c0_3] : memref<16x128xf32, #tpu.memory_space<vmem>>, vector<16x128xf32>
    %cst = arith.constant dense<0.000000e+00> : vector<16x128xf32>
    %5 = tpu.matmul %3, %4, %cst {dimension_numbers = #tpu.dot_dimension_numbers<[1], [0], [0], [1], [0, 0, 1, 1], [], []>} : vector<16x16xf32>, vector<16x128xf32>, vector<16x128xf32> -> vector<16x128xf32>
    %c0_4 = arith.constant 0 : index
    %c0_5 = arith.constant 0 : index
    %6 = vector.load %arg6[%c0_4, %c0_5] : memref<16x1xf32, #tpu.memory_space<vmem>>, vector<16x1xf32>
    %7 = vector.broadcast %6 : vector<16x1xf32> to vector<16x128xf32>
    %8 = arith.mulf %7, %4 : vector<16x128xf32>
    %9 = arith.subf %5, %8 : vector<16x128xf32>
    %c0_6 = arith.constant 0 : index
    %c0_7 = arith.constant 0 : index
    %10 = vector.load %arg4[%c0_6, %c0_7] : memref<16x128xf32, #tpu.memory_space<vmem>>, vector<16x128xf32>
    tpu.vector_store %arg4[%c0_6, %c0_7], %9 {strides = array<i32>} : memref<16x128xf32, #tpu.memory_space<vmem>>, vector<16x128xf32>,
    return
  }
  func.func @transform_0(%arg0: i32) -> (i32, i32) {
    %c0_i32 = arith.constant 0 : i32
    %c0_i32_0 = arith.constant 0 : i32
    %c0_i32_1 = arith.constant 0 : i32
    return %c0_i32, %c0_i32_0 : i32, i32
  }
  func.func @transform_1(%arg0: i32) -> (i32, i32) {
    %c0_i32 = arith.constant 0 : i32
    %c0_i32_0 = arith.constant 0 : i32
    %c0_i32_1 = arith.constant 0 : i32
    return %c0_i32, %c0_i32_0 : i32, i32
  }
  func.func @transform_2(%arg0: i32) -> (i32, i32) {
    %c0_i32 = arith.constant 0 : i32
    %c0_i32_0 = arith.constant 0 : i32
    return %c0_i32, %arg0 : i32, i32
  }
  func.func @transform_3(%arg0: i32) -> (i32, i32) {
    %c0_i32 = arith.constant 0 : i32
    %c0_i32_0 = arith.constant 0 : i32
    return %c0_i32, %arg0 : i32, i32
  }
}

</mosaic_0001>

<bundles_post_ra>
// kernel: tpu_custom_call.1
= control target key start
LH: loop header
LB: loop body
LE: loop exit
PB: predicated region body
PF: predicated region fallthrough
CT: control target
= control target key end

     0   :  { %8 = vsyncpa [#allocation5], 0  ;;  %s366_s0 = inlined_call_operand.hbm [shape: f32[16,16], index: 0, kind: input, shape index: {}]   ;;  %s367_s1 = inlined_call_operand.hbm [shape: f32[16,16], index: 1, kind: input, shape index: {}]   ;;  %s368_s2 = inlined_call_operand.hbm [shape: f32[16,128], index: 2, kind: input, shape index: {}]   ;;  %s369_s3 = inlined_call_operand.hbm [shape: f32[16,128], index: 3, kind: output, shape index: {}]  }
   0x1   :  { %9 = vsyncpa [#allocation8], 0 }
   0x2   :  { %10 = vsyncpa [#allocation6], 0  ;;  %s28_s14 = sshll.u32 %s367_s1, 4  ;;  %s315_s15 = smov [#allocation7]   ;;  %s29_s14 = int_to_ptr.hbm [resolvable:$true] %s28_s14 }
   0x3   :  { %s30_s16 = sshll.u32 %s315_s15, 4  ;;  %s15_s19 = sshll.u32 %s366_s0, 4  ;;  %s31_s16 = int_to_ptr.vmem [resolvable:$true] %s30_s16  ;;  %s16_s19 = int_to_ptr.hbm [resolvable:$true] %s15_s19 }
   0x4   :  { %s316_s20 = smov 128   ;;  %s317_s21 = smov 8  }
   0x5   :  { %36 = dma.hbm_to_vmem [thread:$0]  %s29_s14, 256, %s31_s16, [#allocation8], %s316_s20, %s316_s20, %s317_s21  }
   0x6   :  { %s318_s22 = smov [#allocation4]   ;;  %s41_s1 = sshll.u32 %s368_s2, 4  ;;  %s42_s1 = int_to_ptr.hbm [resolvable:$true] %s41_s1 }
   0x7   :  { %s17_s23 = sshll.u32 %s318_s22, 4  ;;  %s319_s0 = smov [#allocation9]   ;;  %s18_s23 = int_to_ptr.vmem [resolvable:$true] %s17_s23 }
   0x8   :  { %23 = dma.hbm_to_vmem [thread:$0]  %s16_s19, 256, %s18_s23, [#allocation5], %s316_s20, %s316_s20, %s317_s21  }
   0x9   :  { %s43_s26 = sshll.u32 %s319_s0, 4  ;;  %s44_s26 = int_to_ptr.vmem [resolvable:$true] %s43_s26 }
   0xa   :  { %49 = dma.hbm_to_vmem [thread:$0]  %s42_s1, 256, %s44_s26, [#allocation8], %s316_s20, %s316_s20, %s317_s21  }
   0xb   :  { %309 = dma.done.wait [#allocation5], 256  }
   0xc   :  { %310 = vsyncadd [#allocation5], 4294967040 }
   0xd   :  { %311 = dma.done.wait [#allocation8], 512  }
   0xe   :  { %312 = vsyncadd [#allocation8], 4294966784  ;;  %v70_v0 = vlaneseq  ;;  %v66_v3 = vld [vmem:[#allocation4] sm:$0xff]  ;;  %v68_v4 = vld [vmem:[#allocation7] sm:$0xff]  ;;  %vm115_vm2 = vcmask 130048   ;;  %v320_v22 = vmov 0  }
   0xf   :  { %v77_v5 = vmul.f32 %v68_v4, %v66_v3  ;;  %v67_v6 = vld [vmem:[#allocation4 + $0x8] sm:$0xff]  ;;  %v69_v7 = vld [vmem:[#allocation7 + $0x8] sm:$0xff]  ;;  %v129_v13 = vld [vmem:[#allocation9] sm:$0xff]  ;;  %211 = vset.pattern.permute.xlu2 %v320_v22  ;;  %vm124_vm3 = vcmask 7168   ;;  %s321_s2 = smov [#allocation10]   ;;  %s185_s30 = sshll.u32 %s369_s3, 4  ;;  %s186_s30 = int_to_ptr.hbm [resolvable:$true] %s185_s30 }
  0x10   :  { %v71_v1 = vshrl.u32 %v70_v0, 7  ;;  %v74_v2 = vand.u32 127, %v70_v0  ;;  %v78_v10 = vmul.f32 %v69_v7, %v67_v6  ;;  %v130_v12 = vld [vmem:[#allocation9 + $0x8] sm:$0xff]  ;;  %s183_s27 = sshll.u32 %s321_s2, 4  ;;  %s184_s27 = int_to_ptr.vmem [resolvable:$true] %s183_s27 }
  0x11   :  { %152 = vmatpush.msra.mxu0 %v130_v12  ;;  %201 = vmatpush.msra.mxu1 %v130_v12 }
  0x12   :  { %vm75_vm0 = vcmp.ge.s32.totalorder %v71_v1, %v74_v2  ;;  %v72_v8 = vadd.s32 8, %v71_v1 }
  0x13   :  { %v79_v9 = vsel %vm75_vm0, %v77_v5, 0.0  ;;  %153 = vmatpush.msra.mxu0 %v129_v13  ;;  %202 = vmatpush.msra.mxu1 %v129_v13 }
  0x14   :  { %81 = vxpose.xlu0.b32.start [1/2] (short) (narrow) %v79_v9, 16  ;;  %vm76_vm1 = vcmp.ge.s32.totalorder %v72_v8, %v74_v2 }
  0x15   :  { %v80_v11 = vsel %vm76_vm1, %v78_v10, 0.0 }
  0x1c   :  { %82 = vxpose.xlu0.b32.end [2/2] (short) (narrow) %v80_v11, 16 }
  0x83   :  { %212 = vset.pattern.permute.xlu0 %v320_v22 }
  0xb8   :  { %v97_v14 = vpop.trf.xlu0 }
  0xb9   :  { %v113_v15 = vadd.f32 %v97_v14, %v79_v9 }
  0xbb   :  { %116 = vst.msk [vmem:[#allocation2] sm:$0xff] %vm115_vm2, %v113_v15  ;;  %v118_v16 = vsel %vm115_vm2, %v113_v15, 0.0 }
  0xbc   :  { %119 = vadd.xlane.f32.xlu1 %v118_v16 }
  0xc0   :  { %v98_v17 = vpop.trf.xlu0 }
  0xc1   :  { %v114_v18 = vadd.f32 %v98_v17, %v80_v11 }
  0xc2   :  { %v127_v19 = vld [vmem:[#allocation2] sm:$0xff] }
  0xc3   :  { %117 = vst.msk [vmem:[#allocation2 + $0x8] sm:$0xff] %vm115_vm2, %v114_v18  ;;  %199 = vmatmul.msk.f32.vlgmr.msra.gmra.mxu0 %vm115_vm2, %v127_v19  ;;  %v121_v20 = vsel %vm115_vm2, %v114_v18, 0.0 }
  0xc4   :  { %122 = vadd.xlane.f32.xlu1 %v121_v20 }
  0xca   :  { %v128_v21 = vld [vmem:[#allocation2 + $0x8] sm:$0xff] }
  0xcb   :  { %200 = vmatmul.msk.f32.vlgmr.msra.gmra.mxu1 %vm115_vm2, %v128_v21 }
 0x12f   :  { %v120_v23 = vpop.xlane.xlu1 %119 }
 0x130   :  { %125 = vst.msk [vmem:[#allocation3] sm:$0xff] %vm124_vm3, %v120_v23 }
 0x137   :  { %v123_v24 = vpop.xlane.xlu1 %122  ;;  %v161_v25 = vld [vmem:[#allocation3] sm:$0xff] }
 0x138   :  { %126 = vst.msk [vmem:[#allocation3 + $0x8] sm:$0xff] %vm124_vm3, %v123_v24  ;;  %165 = vperm.xlu2 %211, %v161_v25  }
 0x13f   :  { %v162_v26 = vld [vmem:[#allocation3 + $0x8] sm:$0xff] }
 0x140   :  { %170 = vperm.xlu2 %211, %v162_v26   ;;  %v155_v29 = vpop.f32.mrf.mxu0 }
 0x148   :  { %v158_v33 = vpop.f32.mrf.mxu1 }
 0x192   :  { %v166_v27 = vpop.permute.xlu2 %165 }
 0x193   :  { %v173_v28 = vmul.f32 %v166_v27, %v129_v13 }
 0x195   :  { %v175_v30 = vsub.f32 %v155_v29, %v173_v28 }
 0x197   :  { %177 = vst [vmem:[#allocation10] sm:$0xff] %v175_v30 }
 0x19a   :  { %v171_v31 = vpop.permute.xlu2 %170 }
 0x19b   :  { %v174_v32 = vmul.f32 %v171_v31, %v130_v12 }
 0x19d   :  { %v176_v34 = vsub.f32 %v158_v33, %v174_v32 }
 0x19f   :  { %178 = vst [vmem:[#allocation10 + $0x8] sm:$0xff] %v176_v34 }
 0x1a0   :  { %191 = dma.vmem_to_hbm [thread:$0]  %s184_s27, 256, %s186_s30, [#allocation6], %s316_s20, %s316_s20, %s317_s21  }
 0x1a1   :  { %313 = dma.done.wait [#allocation6], 256  }
 0x1a2   :  { %314 = vsyncadd [#allocation6], 4294967040 }
 0x1a3   :  { %196 = vsyncpa [#allocation5], 1 }
 0x1a4   :  { %197 = vsyncpa [#allocation8], 1 }
 0x1a5   :  { %198 = vsyncpa [#allocation6], 1 }

</bundles_post_ra>
